<compile_context>
chip_gen: v6e
topology: v6e:2x2x1
jax: 0.10.0
libtpu: 0.0.40
codegen_flags: <defaults>
</compile_context>

<pallas_src>
import jax
import jax.numpy as jnp
from jax.experimental import pallas as pl
from jax.experimental.pallas import tpu as pltpu

IN_FEATURES = 13
OUT_FEATURES = 2
DEFAULT_TB = 8192          # batch-tile (sublane) height; multiple of 8


def _linear_kernel(wt_ref, b_ref, x_ref, o_ref):
    # wt_ref: VMEM (13, 2) f32   -- torch weight (2, 13), pre-transposed
    # b_ref : VMEM (1, 2)  f32
    # x_ref : VMEM (tb, 13)      -- natural layout batch tile
    # o_ref : VMEM (tb, 2)
    acc = jnp.dot(x_ref[...], wt_ref[...], preferred_element_type=jnp.float32)
    o_ref[...] = (acc + b_ref[...]).astype(o_ref.dtype)


def prediction_net_forward(x, weight, bias, *, tb=DEFAULT_TB):
    """x: (B, 13) f32; weight: (2, 13) f32; bias: (2,) f32 -> (B, 2) f32."""
    B = x.shape[0]
    # If the whole batch fits in one tile, use the exact batch size
    # (block dim == full array dim is always legal, even if not a multiple
    # of 8).  Otherwise use tb (multiple of 8); the last block may be ragged
    # and is handled by the BlockSpec without any explicit padding.
    tb_eff = B if B <= tb else tb
    grid = (pl.cdiv(B, tb_eff),)

    w_t = weight.T.astype(jnp.float32)            # (13, 2): 26 scalars, negligible
    b2 = bias.reshape(1, OUT_FEATURES).astype(jnp.float32)

    out = pl.pallas_call(
        _linear_kernel,
        out_shape=jax.ShapeDtypeStruct((B, OUT_FEATURES), x.dtype),
        grid_spec=pltpu.PrefetchScalarGridSpec(
            num_scalar_prefetch=0,
            grid=grid,
            in_specs=[
                pl.BlockSpec((IN_FEATURES, OUT_FEATURES), lambda i: (0, 0)),  # W.T
                pl.BlockSpec((1, OUT_FEATURES), lambda i: (0, 0)),            # bias
                pl.BlockSpec((tb_eff, IN_FEATURES), lambda i: (i, 0)),        # x tile
            ],
            out_specs=pl.BlockSpec((tb_eff, OUT_FEATURES), lambda i: (i, 0)),
        ),
        compiler_params=pltpu.CompilerParams(
            dimension_semantics=("parallel",),
            vmem_limit_bytes=32 * 1024 * 1024,
        ),
        cost_estimate=pl.CostEstimate(
            flops=2 * B * IN_FEATURES * OUT_FEATURES,
            transcendentals=0,
            bytes_accessed=(B * (IN_FEATURES + OUT_FEATURES) * 4
                            + IN_FEATURES * OUT_FEATURES * 4
                            + OUT_FEATURES * 4),
        ),
    )(w_t, b2, x)

    return out


def init_params(key):
    # Deterministic init mirroring torch.nn.Linear default: U(-k, k), k = 1/sqrt(fan_in)
    kw, kb = jax.random.split(key)
    bound = 1.0 / jnp.sqrt(jnp.float32(IN_FEATURES))
    weight = jax.random.uniform(
        kw, (OUT_FEATURES, IN_FEATURES), jnp.float32, -bound, bound
    )
    bias = jax.random.uniform(kb, (OUT_FEATURES,), jnp.float32, -bound, bound)
    return weight, bias


if __name__ == "__main__":
    key = jax.random.PRNGKey(0)
    k_param, k_x1, k_x2 = jax.random.split(key, 3)

    weight, bias = init_params(k_param)

    # Small batch: single (B, 13) block, grid = (1,).
    batch = 8
    x = jax.random.normal(k_x1, (batch, IN_FEATURES), jnp.float32)
    out = jax.block_until_ready(prediction_net_forward(x, weight, bias))
    ref = x @ weight.T + bias
    assert out.shape == (batch, OUT_FEATURES)
    assert jnp.allclose(out, ref, atol=1e-5, rtol=1e-5)

    # Multi-tile + ragged last block path (tb override keeps the test small):
    # 600 = 2*256 + 88 -> grid = (3,), last block partial, no padding needed.
    batch2 = 600
    x2 = jax.random.normal(k_x2, (batch2, IN_FEATURES), jnp.float32)
    out2 = jax.block_until_ready(prediction_net_forward(x2, weight, bias, tb=256))
    ref2 = x2 @ weight.T + bias
    assert out2.shape == (batch2, OUT_FEATURES)
    assert jnp.allclose(out2, ref2, atol=1e-5, rtol=1e-5)

    print("KERNEL_OK")
</pallas_src>

<mosaic_0001>
module attributes {stable_mosaic.version = 11 : i64} {
  func.func @_linear_kernel(%arg0: i32, %arg1: memref<13x2xf32, #tpu.memory_space<vmem>>, %arg2: memref<1x2xf32, #tpu.memory_space<vmem>>, %arg3: memref<8x13xf32, #tpu.memory_space<vmem>>, %arg4: memref<8x2xf32, #tpu.memory_space<vmem>>) attributes {dimension_semantics = [#tpu.dimension_semantics<parallel>], iteration_bounds = array<i64: 1>, scalar_prefetch = 0 : i64, scratch_operands = 0 : i64, tpu.core_type = #tpu.core_type<tc>, window_params = [{pipeline_mode = #tpu.pipeline_mode<synchronous>, transform_indices = @transform_0, window_bounds = array<i64: 13, 2>}, {pipeline_mode = #tpu.pipeline_mode<synchronous>, transform_indices = @transform_1, window_bounds = array<i64: 1, 2>}, {transform_indices = @transform_2, window_bounds = array<i64: 8, 13>}, {transform_indices = @transform_3, window_bounds = array<i64: 8, 2>}]} {
    %c0 = arith.constant 0 : index
    %c0_0 = arith.constant 0 : index
    %0 = vector.load %arg3[%c0, %c0_0] : memref<8x13xf32, #tpu.memory_space<vmem>>, vector<8x13xf32>
    %c0_1 = arith.constant 0 : index
    %c0_2 = arith.constant 0 : index
    %1 = vector.load %arg1[%c0_1, %c0_2] : memref<13x2xf32, #tpu.memory_space<vmem>>, vector<13x2xf32>
    %cst = arith.constant dense<0.000000e+00> : vector<8x2xf32>
    %2 = tpu.matmul %0, %1, %cst {dimension_numbers = #tpu.dot_dimension_numbers<[1], [0], [0], [1], [0, 0, 1, 1], [], []>} : vector<8x13xf32>, vector<13x2xf32>, vector<8x2xf32> -> vector<8x2xf32>
    %c0_3 = arith.constant 0 : index
    %c0_4 = arith.constant 0 : index
    %3 = vector.load %arg2[%c0_3, %c0_4] : memref<1x2xf32, #tpu.memory_space<vmem>>, vector<1x2xf32>
    %4 = vector.broadcast %3 : vector<1x2xf32> to vector<8x2xf32>
    %5 = arith.addf %2, %4 : vector<8x2xf32>
    %c0_5 = arith.constant 0 : index
    %c0_6 = arith.constant 0 : index
    %6 = vector.load %arg4[%c0_5, %c0_6] : memref<8x2xf32, #tpu.memory_space<vmem>>, vector<8x2xf32>
    tpu.vector_store %arg4[%c0_5, %c0_6], %5 {strides = array<i32>} : memref<8x2xf32, #tpu.memory_space<vmem>>, vector<8x2xf32>,
    return
  }
  func.func @transform_0(%arg0: i32) -> (i32, i32) {
    %c0_i32 = arith.constant 0 : i32
    %c0_i32_0 = arith.constant 0 : i32
    %c0_i32_1 = arith.constant 0 : i32
    return %c0_i32, %c0_i32_0 : i32, i32
  }
  func.func @transform_1(%arg0: i32) -> (i32, i32) {
    %c0_i32 = arith.constant 0 : i32
    %c0_i32_0 = arith.constant 0 : i32
    %c0_i32_1 = arith.constant 0 : i32
    return %c0_i32, %c0_i32_0 : i32, i32
  }
  func.func @transform_2(%arg0: i32) -> (i32, i32) {
    %c0_i32 = arith.constant 0 : i32
    %c0_i32_0 = arith.constant 0 : i32
    return %arg0, %c0_i32 : i32, i32
  }
  func.func @transform_3(%arg0: i32) -> (i32, i32) {
    %c0_i32 = arith.constant 0 : i32
    %c0_i32_0 = arith.constant 0 : i32
    return %arg0, %c0_i32 : i32, i32
  }
}

</mosaic_0001>

<bundles_post_ra>
// kernel: tpu_custom_call.1
= control target key start
LH: loop header
LB: loop body
LE: loop exit
PB: predicated region body
PF: predicated region fallthrough
CT: control target
= control target key end

     0   :  { %vm28_vm0 = vcmask 1044480   ;;  %v123_v0 = vmov 0.0   ;;  %vm124_vm1 = vmmov 0   ;;  %vm24_vm2 = vcmask 105472   ;;  %s160_s0 = inlined_call_operand.vmem [shape: f32[13,2], index: 0, kind: input, shape index: {}]   ;;  %s161_s2 = inlined_call_operand.vmem [shape: f32[8,13], index: 2, kind: input, shape index: {}]   ;;  %s162_s1 = inlined_call_operand.vmem [shape: f32[1,2], index: 1, kind: input, shape index: {}]   ;;  %s163_s3 = inlined_call_operand.vmem [shape: f32[8,2], index: 3, kind: output, shape index: {}]  }
   0x1   :  { %114 = vmatprep.subr.mxu0 %v123_v0  ;;  %v16_v1 = vld [vmem:[%s160_s0 + $0x8] sm:$0x1f]  ;;  %v15_v2 = vld [vmem:[%s160_s0] sm:$0xff]  ;;  %118 = vmatprep.mubr.msk.f32.mxu0 %vm124_vm1, %v123_v0  ;;  %vm102_vm3 = vcmask 15360  }
   0x2   :  { %115 = vmatpush3.msk.msra.mxu0 %vm28_vm0, %v16_v1  ;;  %v14_v3 = vld [vmem:[%s161_s2] sm:$0xff] }
   0x3   :  { %116 = vmatprep.subr.mxu0 %v123_v0  ;;  %v108_v4 = vld [vmem:[%s162_s1] ss:$0 sm:$0xff] }
   0x4   :  { %117 = vmatpush3.msra.mxu0 %v15_v2 }
   0x5   :  { %119 = vmatmul.mubr.msk.f32.vlgmr.msra.gmra.mxu0 %vm24_vm2, %v14_v3 }
  0xc5   :  { %v98_v5 = vpop.f32.mrf.mxu0 }
  0xc6   :  { %v99_v6 = vadd.f32 %v108_v4, %v98_v5 }
  0xc7   :  { %v120_v7 = vpop.f32.mrf.mxu0 }
  0xc8   :  { %103 = vst.msk [vmem:[%s163_s3] sm:$0xff] %vm102_vm3, %v99_v6 }

</bundles_post_ra>
